<compile_context>
chip_gen: v5e
topology: v5e:2x2
jax: 0.10.0
libtpu: 0.0.40
codegen_flags: <defaults>
</compile_context>

<pallas_src>
import functools

import jax
import jax.numpy as jnp
from jax.experimental import pallas as pl
from jax.experimental.pallas import tpu as pltpu


_VMEM_BUDGET = 32 * 1024 * 1024   # target working-set bound used to cap TB
_VMEM_LIMIT = 48 * 1024 * 1024    # scoped VMEM limit handed to Mosaic


def _round_up(x: int, m: int) -> int:
    return (x + m - 1) // m * m


def _vmem_estimate(tb: int, k: int, h: int, n: int) -> int:
    """Rough per-step VMEM footprint (bytes): double-buffered x/out tiles,
    resident bf16 weights (counted double-buffered to be safe), f32 biases,
    and the f32 h1/h2 temporaries."""
    x_buf = 2 * tb * k * 4
    o_buf = 2 * tb * n * 4
    w_buf = 2 * 2 * (k * h + h * h + h * n)
    b_buf = 2 * 4 * (2 * h + n)
    tmp = 2 * tb * h * 4
    return x_buf + o_buf + w_buf + b_buf + tmp


def _max_tb_for_vmem(k: int, h: int, n: int, start: int) -> int:
    tb = max(16, start)
    while tb > 16 and _vmem_estimate(tb, k, h, n) > _VMEM_BUDGET:
        tb //= 2
    return max(tb, 16)


def _pick_tile(b: int, max_tb: int):
    """Pick (TB, steps) so that steps*TB >= B with < 16*steps wasted rows,
    and steps >= 2 whenever there is enough work to feed both v7x cores."""
    steps = pl.cdiv(b, max_tb)
    if steps == 1 and b >= 256:
        steps = 2
    tb = max(16, _round_up(pl.cdiv(b, steps), 16))
    return tb, steps


def mlp_kernel(x_ref, w1_ref, b1_ref, w2_ref, b2_ref, w3_ref, b3_ref, o_ref):
    # Cast the f32 x tile to bf16 in-kernel (no wrapper pre-pass).
    x = x_ref[...].astype(jnp.bfloat16)
    # Layer 1: bf16-operand / f32-accumulate matmul on the MXU, bias+ReLU in f32.
    h1 = jnp.dot(x, w1_ref[...], preferred_element_type=jnp.float32)
    h1 = jnp.maximum(h1 + b1_ref[...], 0.0)
    # Layer 2.
    h2 = jnp.dot(h1.astype(jnp.bfloat16), w2_ref[...],
                 preferred_element_type=jnp.float32)
    h2 = jnp.maximum(h2 + b2_ref[...], 0.0)
    # Layer 3 (no activation); output block is unpadded in N (masked store),
    # which cuts writeback bytes for small num_output.
    out = jnp.dot(h2.astype(jnp.bfloat16), w3_ref[...],
                  preferred_element_type=jnp.float32)
    o_ref[...] = (out + b3_ref[...]).astype(o_ref.dtype)


@functools.partial(jax.jit, static_argnames=("block_b",))
def mlp_forward(x, kparams, *, block_b=1024):
    """x: [B, num_input] float32.
    kparams: output of prepare_params() — bf16 [in, out] weights, f32 (1, out) biases."""
    w1, b1 = kparams["w1"], kparams["b1"]
    w2, b2 = kparams["w2"], kparams["b2"]
    w3, b3 = kparams["w3"], kparams["b3"]

    B, K = x.shape
    H = w1.shape[1]
    N = w3.shape[1]

    max_tb = _max_tb_for_vmem(K, H, N, start=block_b)
    TB, steps = _pick_tile(B, max_tb)
    B_pad = TB * steps

    if B_pad != B:
        # Only pad the batch (zeros); K/H/N stay unpadded (full-dim blocks).
        x = jnp.pad(x, ((0, B_pad - B), (0, 0)))

    full = lambda a: pl.BlockSpec(a.shape, lambda i, _nd=a.ndim: (0,) * _nd)

    out = pl.pallas_call(
        mlp_kernel,
        out_shape=jax.ShapeDtypeStruct((B_pad, N), jnp.float32),
        grid_spec=pltpu.PrefetchScalarGridSpec(
            num_scalar_prefetch=0,
            grid=(steps,),
            in_specs=[
                pl.BlockSpec((TB, K), lambda i: (i, 0)),   # x tile (f32, full K)
                full(w1), full(b1),                         # grid-invariant weights
                full(w2), full(b2),
                full(w3), full(b3),
            ],
            out_specs=pl.BlockSpec((TB, N), lambda i: (i, 0)),
        ),
        compiler_params=pltpu.CompilerParams(
            dimension_semantics=("parallel",),   # shard batch tiles across TCs (v7x)
            vmem_limit_bytes=_VMEM_LIMIT,
        ),
    )(x, w1, b1, w2, b2, w3, b3)

    if B_pad != B:
        out = out[:B]
    return out


def init_params(key, num_input, num_output, num_hidden=128, dtype=jnp.float32):
    """PyTorch-style uniform(-1/sqrt(fan_in), 1/sqrt(fan_in)) init.

    Weights are stored transposed relative to nn.Linear: shape [in, out], so the
    kernel computes y = x @ W + b (== x @ W_pt.T + b_pt)."""
    def linear(k, fan_in, fan_out):
        kw, kb = jax.random.split(k)
        bound = 1.0 / jnp.sqrt(fan_in)
        w = jax.random.uniform(kw, (fan_in, fan_out), dtype, -bound, bound)
        b = jax.random.uniform(kb, (1, fan_out), dtype, -bound, bound)
        return w, b

    k1, k2, k3 = jax.random.split(key, 3)
    w1, b1 = linear(k1, num_input, num_hidden)
    w2, b2 = linear(k2, num_hidden, num_hidden)
    w3, b3 = linear(k3, num_hidden, num_output)
    return {"w1": w1, "b1": b1, "w2": w2, "b2": b2, "w3": w3, "b3": b3}


def prepare_params(params):
    """One-time conversion of weights to bf16 MXU operands (biases stay f32).
    Done once at init so no pad/cast pre-passes run per forward call."""
    return {
        "w1": params["w1"].astype(jnp.bfloat16), "b1": params["b1"].astype(jnp.float32),
        "w2": params["w2"].astype(jnp.bfloat16), "b2": params["b2"].astype(jnp.float32),
        "w3": params["w3"].astype(jnp.bfloat16), "b3": params["b3"].astype(jnp.float32),
    }


def mlp_reference_f32(x, p):
    h1 = jnp.maximum(x @ p["w1"] + p["b1"], 0.0)
    h2 = jnp.maximum(h1 @ p["w2"] + p["b2"], 0.0)
    return h2 @ p["w3"] + p["b3"]


def mlp_reference_bf16(x, p):
    """Reference mirroring the kernel's bf16-operand / f32-accumulate matmuls."""
    bf16, f32 = jnp.bfloat16, jnp.float32
    h1 = jnp.dot(x.astype(bf16), p["w1"].astype(bf16),
                 preferred_element_type=f32) + p["b1"]
    h1 = jnp.maximum(h1, 0.0)
    h2 = jnp.dot(h1.astype(bf16), p["w2"].astype(bf16),
                 preferred_element_type=f32) + p["b2"]
    h2 = jnp.maximum(h2, 0.0)
    return jnp.dot(h2.astype(bf16), p["w3"].astype(bf16),
                   preferred_element_type=f32) + p["b3"]


if __name__ == "__main__":
    key = jax.random.PRNGKey(0)
    k_param, k_x1, k_x2 = jax.random.split(key, 3)

    batch, num_input, num_hidden, num_output = 8, 32, 128, 16
    params = init_params(k_param, num_input, num_output, num_hidden)
    kparams = prepare_params(params)

    # Small-batch path (single grid step, TB floored at 16).
    x = jax.random.normal(k_x1, (batch, num_input), dtype=jnp.float32)
    out = mlp_forward(x, kparams)
    jax.block_until_ready(out)
    assert out.shape == (batch, num_output)
    ref_bf16 = mlp_reference_bf16(x, params)
    assert jnp.allclose(out, ref_bf16, atol=2e-2, rtol=2e-2)
    ref_f32 = mlp_reference_f32(x, params)
    assert jnp.allclose(out, ref_f32, atol=5e-2, rtol=5e-2)

    # Multi-step grid path with a ragged batch (exercises 2-step parallel grid
    # + minimal batch-tail padding).
    x2 = jax.random.normal(k_x2, (300, num_input), dtype=jnp.float32)
    out2 = mlp_forward(x2, kparams)
    jax.block_until_ready(out2)
    assert out2.shape == (300, num_output)
    assert jnp.allclose(out2, mlp_reference_bf16(x2, params), atol=2e-2, rtol=2e-2)

    print("KERNEL_OK")
</pallas_src>

<mosaic_0001>
module attributes {stable_mosaic.version = 11 : i64} {
  func.func @mlp_kernel(%arg0: i32, %arg1: memref<16x32xf32, #tpu.memory_space<vmem>>, %arg2: memref<32x128xbf16, #tpu.memory_space<vmem>>, %arg3: memref<1x128xf32, #tpu.memory_space<vmem>>, %arg4: memref<128x128xbf16, #tpu.memory_space<vmem>>, %arg5: memref<1x128xf32, #tpu.memory_space<vmem>>, %arg6: memref<128x16xbf16, #tpu.memory_space<vmem>>, %arg7: memref<1x16xf32, #tpu.memory_space<vmem>>, %arg8: memref<16x16xf32, #tpu.memory_space<vmem>>) attributes {dimension_semantics = [#tpu.dimension_semantics<parallel>], iteration_bounds = array<i64: 1>, scalar_prefetch = 0 : i64, scratch_operands = 0 : i64, tpu.core_type = #tpu.core_type<tc>, window_params = [{transform_indices = @transform_0, window_bounds = array<i64: 16, 32>}, {pipeline_mode = #tpu.pipeline_mode<synchronous>, transform_indices = @transform_1, window_bounds = array<i64: 32, 128>}, {pipeline_mode = #tpu.pipeline_mode<synchronous>, transform_indices = @transform_2, window_bounds = array<i64: 1, 128>}, {pipeline_mode = #tpu.pipeline_mode<synchronous>, transform_indices = @transform_3, window_bounds = array<i64: 128, 128>}, {pipeline_mode = #tpu.pipeline_mode<synchronous>, transform_indices = @transform_4, window_bounds = array<i64: 1, 128>}, {pipeline_mode = #tpu.pipeline_mode<synchronous>, transform_indices = @transform_5, window_bounds = array<i64: 128, 16>}, {pipeline_mode = #tpu.pipeline_mode<synchronous>, transform_indices = @transform_6, window_bounds = array<i64: 1, 16>}, {transform_indices = @transform_7, window_bounds = array<i64: 16, 16>}]} {
    %c0 = arith.constant 0 : index
    %c0_0 = arith.constant 0 : index
    %0 = vector.load %arg1[%c0, %c0_0] : memref<16x32xf32, #tpu.memory_space<vmem>>, vector<16x32xf32>
    %1 = arith.truncf %0 : vector<16x32xf32> to vector<16x32xbf16>
    %c0_1 = arith.constant 0 : index
    %c0_2 = arith.constant 0 : index
    %2 = vector.load %arg2[%c0_1, %c0_2] : memref<32x128xbf16, #tpu.memory_space<vmem>>, vector<32x128xbf16>
    %cst = arith.constant dense<0.000000e+00> : vector<16x128xf32>
    %3 = tpu.matmul %1, %2, %cst {dimension_numbers = #tpu.dot_dimension_numbers<[1], [0], [0], [1], [0, 0, 1, 1], [], []>} : vector<16x32xbf16>, vector<32x128xbf16>, vector<16x128xf32> -> vector<16x128xf32>
    %c0_3 = arith.constant 0 : index
    %c0_4 = arith.constant 0 : index
    %4 = vector.load %arg3[%c0_3, %c0_4] : memref<1x128xf32, #tpu.memory_space<vmem>>, vector<1x128xf32>
    %5 = vector.broadcast %4 : vector<1x128xf32> to vector<16x128xf32>
    %6 = arith.addf %3, %5 : vector<16x128xf32>
    %cst_5 = arith.constant 0.000000e+00 : f32
    %7 = vector.broadcast %cst_5 : f32 to vector<16x128xf32>
    %8 = arith.maximumf %6, %7 : vector<16x128xf32>
    %9 = arith.truncf %8 : vector<16x128xf32> to vector<16x128xbf16>
    %c0_6 = arith.constant 0 : index
    %c0_7 = arith.constant 0 : index
    %10 = vector.load %arg4[%c0_6, %c0_7] : memref<128x128xbf16, #tpu.memory_space<vmem>>, vector<128x128xbf16>
    %cst_8 = arith.constant dense<0.000000e+00> : vector<16x128xf32>
    %11 = tpu.matmul %9, %10, %cst_8 {dimension_numbers = #tpu.dot_dimension_numbers<[1], [0], [0], [1], [0, 0, 1, 1], [], []>} : vector<16x128xbf16>, vector<128x128xbf16>, vector<16x128xf32> -> vector<16x128xf32>
    %c0_9 = arith.constant 0 : index
    %c0_10 = arith.constant 0 : index
    %12 = vector.load %arg5[%c0_9, %c0_10] : memref<1x128xf32, #tpu.memory_space<vmem>>, vector<1x128xf32>
    %13 = vector.broadcast %12 : vector<1x128xf32> to vector<16x128xf32>
    %14 = arith.addf %11, %13 : vector<16x128xf32>
    %cst_11 = arith.constant 0.000000e+00 : f32
    %15 = vector.broadcast %cst_11 : f32 to vector<16x128xf32>
    %16 = arith.maximumf %14, %15 : vector<16x128xf32>
    %17 = arith.truncf %16 : vector<16x128xf32> to vector<16x128xbf16>
    %c0_12 = arith.constant 0 : index
    %c0_13 = arith.constant 0 : index
    %18 = vector.load %arg6[%c0_12, %c0_13] : memref<128x16xbf16, #tpu.memory_space<vmem>>, vector<128x16xbf16>
    %cst_14 = arith.constant dense<0.000000e+00> : vector<16x16xf32>
    %19 = tpu.matmul %17, %18, %cst_14 {dimension_numbers = #tpu.dot_dimension_numbers<[1], [0], [0], [1], [0, 0, 1, 1], [], []>} : vector<16x128xbf16>, vector<128x16xbf16>, vector<16x16xf32> -> vector<16x16xf32>
    %c0_15 = arith.constant 0 : index
    %c0_16 = arith.constant 0 : index
    %20 = vector.load %arg7[%c0_15, %c0_16] : memref<1x16xf32, #tpu.memory_space<vmem>>, vector<1x16xf32>
    %21 = vector.broadcast %20 : vector<1x16xf32> to vector<16x16xf32>
    %22 = arith.addf %19, %21 : vector<16x16xf32>
    %c0_17 = arith.constant 0 : index
    %c0_18 = arith.constant 0 : index
    %23 = vector.load %arg8[%c0_17, %c0_18] : memref<16x16xf32, #tpu.memory_space<vmem>>, vector<16x16xf32>
    tpu.vector_store %arg8[%c0_17, %c0_18], %22 {strides = array<i32>} : memref<16x16xf32, #tpu.memory_space<vmem>>, vector<16x16xf32>,
    return
  }
  func.func @transform_0(%arg0: i32) -> (i32, i32) {
    %c0_i32 = arith.constant 0 : i32
    %c0_i32_0 = arith.constant 0 : i32
    return %arg0, %c0_i32 : i32, i32
  }
  func.func @transform_1(%arg0: i32) -> (i32, i32) {
    %c0_i32 = arith.constant 0 : i32
    %c0_i32_0 = arith.constant 0 : i32
    %c0_i32_1 = arith.constant 0 : i32
    return %c0_i32, %c0_i32_0 : i32, i32
  }
  func.func @transform_2(%arg0: i32) -> (i32, i32) {
    %c0_i32 = arith.constant 0 : i32
    %c0_i32_0 = arith.constant 0 : i32
    %c0_i32_1 = arith.constant 0 : i32
    return %c0_i32, %c0_i32_0 : i32, i32
  }
  func.func @transform_3(%arg0: i32) -> (i32, i32) {
    %c0_i32 = arith.constant 0 : i32
    %c0_i32_0 = arith.constant 0 : i32
    %c0_i32_1 = arith.constant 0 : i32
    return %c0_i32, %c0_i32_0 : i32, i32
  }
  func.func @transform_4(%arg0: i32) -> (i32, i32) {
    %c0_i32 = arith.constant 0 : i32
    %c0_i32_0 = arith.constant 0 : i32
    %c0_i32_1 = arith.constant 0 : i32
    return %c0_i32, %c0_i32_0 : i32, i32
  }
  func.func @transform_5(%arg0: i32) -> (i32, i32) {
    %c0_i32 = arith.constant 0 : i32
    %c0_i32_0 = arith.constant 0 : i32
    %c0_i32_1 = arith.constant 0 : i32
    return %c0_i32, %c0_i32_0 : i32, i32
  }
  func.func @transform_6(%arg0: i32) -> (i32, i32) {
    %c0_i32 = arith.constant 0 : i32
    %c0_i32_0 = arith.constant 0 : i32
    %c0_i32_1 = arith.constant 0 : i32
    return %c0_i32, %c0_i32_0 : i32, i32
  }
  func.func @transform_7(%arg0: i32) -> (i32, i32) {
    %c0_i32 = arith.constant 0 : i32
    %c0_i32_0 = arith.constant 0 : i32
    return %arg0, %c0_i32 : i32, i32
  }
}

</mosaic_0001>

<bundles_post_ra>
// kernel: mlp_forward.1
= control target key start
LH: loop header
LB: loop body
LE: loop exit
PB: predicated region body
PF: predicated region fallthrough
CT: control target
= control target key end

     0   :  { %vm50_vm0 = vcmask 261120   ;;  %vm238_vm1 = vcmask 130048   ;;  %s454_s1 = inlined_call_operand.vmem [shape: bf16[32,128], index: 1, kind: input, shape index: {}]   ;;  %s455_s0 = inlined_call_operand.vmem [shape: f32[16,32], index: 0, kind: input, shape index: {}]   ;;  %s456_s3 = inlined_call_operand.vmem [shape: bf16[128,128], index: 3, kind: input, shape index: {}]   ;;  %s457_s2 = inlined_call_operand.vmem [shape: f32[1,128], index: 2, kind: input, shape index: {}]   ;;  %s458_s4 = inlined_call_operand.vmem [shape: f32[1,128], index: 4, kind: input, shape index: {}]   ;;  %s459_s5 = inlined_call_operand.vmem [shape: bf16[128,16], index: 5, kind: input, shape index: {}]   ;;  %s460_s6 = inlined_call_operand.vmem [shape: f32[1,16], index: 6, kind: input, shape index: {}]   ;;  %s461_s7 = inlined_call_operand.vmem [shape: f32[16,16], index: 7, kind: output, shape index: {}]  }
   0x1   :  { %v319_v0 = vld [vmem:[%s454_s1 + $0x8] sm:$0xff]  ;;  %v318_v1 = vld [vmem:[%s454_s1] sm:$0xff]  ;;  %v327_v2 = vld [vmem:[%s456_s3 + $0x38] sm:$0xff] }
   0x2   :  { %60 = vmatpush.bf16.msra.mxu0 %v319_v0  ;;  %v27_v3 = vld [vmem:[%s455_s0] sm:$0xff]  ;;  %v28_v4 = vld [vmem:[%s455_s0 + $0x8] sm:$0xff]  ;;  %139 = vmatpush.bf16.msra.mxu1 %v327_v2  ;;  %v326_v5 = vld [vmem:[%s456_s3 + $0x30] sm:$0xff] }
   0x3   :  { %v29_v6 = vpack.c.bf16 %v28_v4, %v27_v3  ;;  %v325_v7 = vld [vmem:[%s456_s3 + $0x28] sm:$0xff]  ;;  %v324_v8 = vld [vmem:[%s456_s3 + $0x20] sm:$0xff]  ;;  %v323_v9 = vld [vmem:[%s456_s3 + $0x18] sm:$0xff] }
   0x4   :  { %v322_v10 = vld [vmem:[%s456_s3 + $0x10] sm:$0xff]  ;;  %v321_v11 = vld [vmem:[%s456_s3 + $0x8] sm:$0xff]  ;;  %v320_v12 = vld [vmem:[%s456_s3] sm:$0xff] }
   0x5   :  { %v335_v13 = vld [vmem:[%s459_s5 + $0x38] sm:$0xff]  ;;  %v334_v14 = vld [vmem:[%s459_s5 + $0x30] sm:$0xff]  ;;  %v333_v15 = vld [vmem:[%s459_s5 + $0x28] sm:$0xff] }
   0x6   :  { %61 = vmatpush.bf16.msra.mxu0 %v318_v1  ;;  %140 = vmatpush.bf16.msra.mxu1 %v326_v5  ;;  %v332_v16 = vld [vmem:[%s459_s5 + $0x20] sm:$0xff]  ;;  %v331_v25 = vld [vmem:[%s459_s5 + $0x18] sm:$0xff]  ;;  %v330_v26 = vld [vmem:[%s459_s5 + $0x10] sm:$0xff] }
   0x7   :  { %224 = vmatpush.bf16.msra.mxu2 %v335_v13  ;;  %v336_v18 = vld [vmem:[%s457_s2] ss:$0 sm:$0xff]  ;;  %v329_v27 = vld [vmem:[%s459_s5 + $0x8] sm:$0xff] }
   0x8   :  { %v328_v28 = vld [vmem:[%s459_s5] sm:$0xff] }
   0x9   :  { %253 = vmatmul.msk.bf16.vlgmr.msra.gmra.mxu0 %vm50_vm0, %v29_v6  ;;  %v337_v30 = vld [vmem:[%s458_s4] ss:$0 sm:$0xff] }
   0xa   :  { %141 = vmatpush.bf16.msra.mxu1 %v325_v7  ;;  %v338_v37 = vld [vmem:[%s460_s6] ss:$0 sm:$0xff] }
   0xb   :  { %225 = vmatpush.bf16.msra.mxu2 %v334_v14 }
   0xe   :  { %142 = vmatpush.bf16.msra.mxu1 %v324_v8 }
   0xf   :  { %226 = vmatpush.bf16.msra.mxu2 %v333_v15 }
  0x12   :  { %143 = vmatpush.bf16.msra.mxu1 %v323_v9 }
  0x13   :  { %227 = vmatpush.bf16.msra.mxu2 %v332_v16 }
  0x16   :  { %144 = vmatpush.bf16.msra.mxu1 %v322_v10 }
  0x17   :  { %228 = vmatpush.bf16.msra.mxu2 %v331_v25 }
  0x1a   :  { %145 = vmatpush.bf16.msra.mxu1 %v321_v11 }
  0x1b   :  { %229 = vmatpush.bf16.msra.mxu2 %v330_v26 }
  0x1e   :  { %146 = vmatpush.bf16.msra.mxu1 %v320_v12 }
  0x1f   :  { %230 = vmatpush.bf16.msra.mxu2 %v329_v27 }
  0x23   :  { %231 = vmatpush.bf16.msra.mxu2 %v328_v28 }
  0x86   :  { %v63_v17 = vpop.f32.mrf.mxu0 }
  0x87   :  { %v64_v19 = vadd.f32 %v336_v18, %v63_v17 }
  0x89   :  { %v68_v22 = vmax.f32 %v64_v19, 0.0 }
  0x8e   :  { %v65_v20 = vpop.f32.mrf.mxu0 }
  0x8f   :  { %v66_v21 = vadd.f32 %v336_v18, %v65_v20 }
  0x91   :  { %v69_v23 = vmax.f32 %v66_v21, 0.0 }
  0x93   :  { %v70_v24 = vpack.c.bf16 %v69_v23, %v68_v22 }
  0x95   :  { %147 = vmatmul.bf16.vlgmr.msra.gmra.mxu1 %v70_v24 }
 0x112   :  { %v148_v29 = vpop.f32.mrf.mxu1 }
 0x113   :  { %v149_v31 = vadd.f32 %v337_v30, %v148_v29 }
 0x115   :  { %v153_v34 = vmax.f32 %v149_v31, 0.0 }
 0x11a   :  { %v150_v32 = vpop.f32.mrf.mxu1 }
 0x11b   :  { %v151_v33 = vadd.f32 %v337_v30, %v150_v32 }
 0x11d   :  { %v154_v35 = vmax.f32 %v151_v33, 0.0 }
 0x11f   :  { %v155_v36 = vpack.c.bf16 %v154_v35, %v153_v34 }
 0x121   :  { %232 = vmatmul.bf16.vlgmr.msra.gmra.mxu2 %v155_v36 }
 0x1a4   :  { %v233_v38 = vpop.f32.mrf.mxu2 }
 0x1a5   :  { %v234_v39 = vadd.f32 %v338_v37, %v233_v38 }
 0x1a7   :  { %239 = vst.msk [vmem:[%s461_s7] sm:$0xff] %vm238_vm1, %v234_v39 }
 0x1ac   :  { %v235_v40 = vpop.f32.mrf.mxu2 }
 0x1ad   :  { %v236_v41 = vadd.f32 %v338_v37, %v235_v40 }
 0x1af   :  { %240 = vst.msk [vmem:[%s461_s7 + $0x8] sm:$0xff] %vm238_vm1, %v236_v41 }

</bundles_post_ra>
